<compile_context>
chip_gen: v5e
topology: v5e:2x2
jax: 0.10.0
libtpu: 0.0.40
codegen_flags: <defaults>
</compile_context>

<pallas_src>
import jax
import jax.numpy as jnp
from jax.experimental import pallas as pl
from jax.experimental.pallas import tpu as pltpu


def _round_up(a, b):
    return ((a + b - 1) // b) * b


def _conv_bn_gelu_kernel(p_ref, w_ref, scale_ref, shift_ref, out_ref):
    # (E, CK) @ (CK, TL) -> (E, TL) on the MXU, bf16 inputs, f32 accumulation.
    acc = jnp.dot(w_ref[...], p_ref[...], preferred_element_type=jnp.float32)
    # BatchNorm1d (inference) folded to per-output-channel scale/shift; (E, 1)
    # broadcasts across the lane (L_out) dimension.
    y = acc * scale_ref[...] + shift_ref[...]
    # Exact GELU: 0.5 * y * (1 + erf(y / sqrt(2)))
    inv_sqrt2 = jnp.float32(0.7071067811865476)
    out_ref[...] = 0.5 * y * (1.0 + jax.lax.erf(y * inv_sqrt2))


def signal2embedding_forward(x, weight, gamma, beta, running_mean, running_var,
                             *, stride, padding=2, eps=1e-5, tile_l=512):
    """x: (N, C_in, L) float32.  weight: (embed_dim, C_in, K).  Returns (N, embed_dim, L_out)."""
    N, C_in, L = x.shape
    E, _, K = weight.shape
    L_out = (L + 2 * padding - K) // stride + 1
    CK = C_in * K

    # Lane tile: multiple of 128, capped so tiny problems don't over-pad.
    tl = min(_round_up(tile_l, 128), _round_up(L_out, 128))
    L_out_pad = _round_up(L_out, tl)

    # ---- glue: im2col in (N, C_in*K, L_out) layout (L_out = lane dim) ----
    x_pad = jnp.pad(x, ((0, 0), (0, 0), (padding, padding)))
    span = (L_out - 1) * stride + 1
    cols = [x_pad[:, :, k:k + span:stride] for k in range(K)]       # K x (N, C_in, L_out)
    patches = jnp.stack(cols, axis=2).reshape(N, CK, L_out)          # index c*K + k
    if L_out_pad != L_out:
        patches = jnp.pad(patches, ((0, 0), (0, 0), (0, L_out_pad - L_out)))
    patches = patches.astype(jnp.bfloat16)                           # halve HBM stream

    w2 = weight.reshape(E, CK).astype(jnp.bfloat16)                  # matches c*K + k order

    # BatchNorm1d (eval) folded to per-channel affine, kept in f32.
    inv_std = 1.0 / jnp.sqrt(running_var.astype(jnp.float32) + eps)
    scale = (gamma * inv_std).reshape(E, 1).astype(jnp.float32)
    shift = (beta - running_mean * gamma * inv_std).reshape(E, 1).astype(jnp.float32)

    grid = (N, L_out_pad // tl)

    out = pl.pallas_call(
        _conv_bn_gelu_kernel,
        out_shape=jax.ShapeDtypeStruct((N, E, L_out_pad), jnp.float32),
        grid_spec=pltpu.PrefetchScalarGridSpec(
            num_scalar_prefetch=0,
            grid=grid,
            in_specs=[
                # im2col patches: batch dim squeezed, (CK, tl) tile, lane-dense.
                pl.BlockSpec((None, CK, tl), lambda n, i: (n, 0, i)),
                # folded conv weight: resident across the whole grid.
                pl.BlockSpec((E, CK), lambda n, i: (0, 0)),
                # BN scale / shift: resident, per-channel column vectors.
                pl.BlockSpec((E, 1), lambda n, i: (0, 0)),
                pl.BlockSpec((E, 1), lambda n, i: (0, 0)),
            ],
            # Output written directly in (N, E, L_out) layout; lane dim = tl (128-multiple).
            out_specs=pl.BlockSpec((None, E, tl), lambda n, i: (n, 0, i)),
        ),
        compiler_params=pltpu.CompilerParams(
            dimension_semantics=("parallel", "parallel"),
            # Blocks are small (<< 1 MiB double-buffered); 32 MiB is safe on
            # v5e/v6e (128 MiB physical) and leaves headroom on v7x (64 MiB).
            vmem_limit_bytes=32 * 1024 * 1024,
        ),
    )(patches, w2, scale, shift)

    # TODO(synk): training-mode dropout (nn.Dropout) and batch-stat BatchNorm are
    # omitted; eval-mode semantics (dropout == identity, running stats) are used.
    return out[:, :, :L_out]  # (N, embed_dim, L_out) -- already in PyTorch layout


def _reference(x, weight, gamma, beta, running_mean, running_var, *, stride, padding=2, eps=1e-5):
    conv = jax.lax.conv_general_dilated(
        x, weight, window_strides=(stride,), padding=[(padding, padding)],
        dimension_numbers=("NCH", "OIH", "NCH"))
    inv_std = 1.0 / jnp.sqrt(running_var + eps)
    y = (conv - running_mean[None, :, None]) * inv_std[None, :, None] * gamma[None, :, None] \
        + beta[None, :, None]
    return 0.5 * y * (1.0 + jax.lax.erf(y * 0.7071067811865476))


if __name__ == "__main__":
    # module hyper-params (small, consistent with the forward pass)
    batch, in_channels, length = 2, 4, 16
    embed_dim, kernel_size, stride = 32, 5, 2

    key = jax.random.PRNGKey(0)
    kx, kw = jax.random.split(key)
    x = jax.random.normal(kx, (batch, in_channels, length), dtype=jnp.float32)
    weight = jax.random.normal(kw, (embed_dim, in_channels, kernel_size), dtype=jnp.float32) * 0.1

    # deterministic BatchNorm1d parameters / running stats
    gamma = jnp.linspace(0.5, 1.5, embed_dim, dtype=jnp.float32)
    beta = jnp.linspace(-0.1, 0.1, embed_dim, dtype=jnp.float32)
    running_mean = jnp.zeros((embed_dim,), dtype=jnp.float32)
    running_var = jnp.ones((embed_dim,), dtype=jnp.float32)

    out = signal2embedding_forward(x, weight, gamma, beta, running_mean, running_var,
                                   stride=stride, padding=2)
    out = jax.block_until_ready(out)

    # Check 1: exactness of the kernel math (conv/BN/GELU) on bf16-rounded inputs.
    xb = x.astype(jnp.bfloat16).astype(jnp.float32)
    wb = weight.astype(jnp.bfloat16).astype(jnp.float32)
    ref_bf16 = _reference(xb, wb, gamma, beta, running_mean, running_var,
                          stride=stride, padding=2)
    assert out.shape == ref_bf16.shape, (out.shape, ref_bf16.shape)
    assert jnp.allclose(out, ref_bf16, atol=1e-4, rtol=1e-4), \
        float(jnp.max(jnp.abs(out - ref_bf16)))

    # Check 2: fidelity to the full-f32 PyTorch module (tolerance loosened for the
    # bf16 matmul inputs; accumulation is f32).
    ref_f32 = _reference(x, weight, gamma, beta, running_mean, running_var,
                         stride=stride, padding=2)
    assert jnp.allclose(out, ref_f32, atol=2e-2, rtol=2e-2), \
        float(jnp.max(jnp.abs(out - ref_f32)))

    print("KERNEL_OK")
</pallas_src>

<mosaic_0001>
module attributes {stable_mosaic.version = 11 : i64} {
  func.func @_conv_bn_gelu_kernel(%arg0: i32, %arg1: i32, %arg2: memref<1x20x128xbf16, #tpu.memory_space<vmem>>, %arg3: memref<32x20xbf16, #tpu.memory_space<vmem>>, %arg4: memref<32x1xf32, #tpu.memory_space<vmem>>, %arg5: memref<32x1xf32, #tpu.memory_space<vmem>>, %arg6: memref<1x32x128xf32, #tpu.memory_space<vmem>>) attributes {dimension_semantics = [#tpu.dimension_semantics<parallel>, #tpu.dimension_semantics<parallel>], iteration_bounds = array<i64: 2, 1>, scalar_prefetch = 0 : i64, scratch_operands = 0 : i64, tpu.core_type = #tpu.core_type<tc>, window_params = [{transform_indices = @transform_0, window_bounds = array<i64: 1, 20, 128>}, {pipeline_mode = #tpu.pipeline_mode<synchronous>, transform_indices = @transform_1, window_bounds = array<i64: 32, 20>}, {pipeline_mode = #tpu.pipeline_mode<synchronous>, transform_indices = @transform_2, window_bounds = array<i64: 32, 1>}, {pipeline_mode = #tpu.pipeline_mode<synchronous>, transform_indices = @transform_3, window_bounds = array<i64: 32, 1>}, {transform_indices = @transform_4, window_bounds = array<i64: 1, 32, 128>}]} {
    %c0 = arith.constant 0 : index
    %c0_0 = arith.constant 0 : index
    %0 = vector.load %arg3[%c0, %c0_0] : memref<32x20xbf16, #tpu.memory_space<vmem>>, vector<32x20xbf16>
    %c0_1 = arith.constant 0 : index
    %c0_2 = arith.constant 0 : index
    %c0_3 = arith.constant 0 : index
    %1 = vector.load %arg2[%c0_1, %c0_2, %c0_3] : memref<1x20x128xbf16, #tpu.memory_space<vmem>>, vector<1x20x128xbf16>
    %2 = vector.shape_cast %1 : vector<1x20x128xbf16> to vector<20x128xbf16>
    %cst = arith.constant dense<0.000000e+00> : vector<32x128xf32>
    %3 = tpu.matmul %0, %2, %cst {dimension_numbers = #tpu.dot_dimension_numbers<[1], [0], [0], [1], [0, 0, 1, 1], [], []>} : vector<32x20xbf16>, vector<20x128xbf16>, vector<32x128xf32> -> vector<32x128xf32>
    %c0_4 = arith.constant 0 : index
    %c0_5 = arith.constant 0 : index
    %4 = vector.load %arg4[%c0_4, %c0_5] : memref<32x1xf32, #tpu.memory_space<vmem>>, vector<32x1xf32>
    %5 = vector.broadcast %4 : vector<32x1xf32> to vector<32x128xf32>
    %6 = arith.mulf %3, %5 : vector<32x128xf32>
    %c0_6 = arith.constant 0 : index
    %c0_7 = arith.constant 0 : index
    %7 = vector.load %arg5[%c0_6, %c0_7] : memref<32x1xf32, #tpu.memory_space<vmem>>, vector<32x1xf32>
    %8 = vector.broadcast %7 : vector<32x1xf32> to vector<32x128xf32>
    %9 = arith.addf %6, %8 : vector<32x128xf32>
    %cst_8 = arith.constant 5.000000e-01 : f32
    %10 = vector.broadcast %cst_8 : f32 to vector<32x128xf32>
    %11 = arith.mulf %10, %9 : vector<32x128xf32>
    %cst_9 = arith.constant 0.707106769 : f32
    %12 = vector.broadcast %cst_9 : f32 to vector<32x128xf32>
    %13 = arith.mulf %9, %12 : vector<32x128xf32>
    %14 = math.erf %13 : vector<32x128xf32>
    %cst_10 = arith.constant 1.000000e+00 : f32
    %15 = vector.broadcast %cst_10 : f32 to vector<32x128xf32>
    %16 = arith.addf %15, %14 : vector<32x128xf32>
    %17 = arith.mulf %11, %16 : vector<32x128xf32>
    %c0_11 = arith.constant 0 : index
    %c0_12 = arith.constant 0 : index
    %c0_13 = arith.constant 0 : index
    %18 = vector.load %arg6[%c0_11, %c0_12, %c0_13] : memref<1x32x128xf32, #tpu.memory_space<vmem>>, vector<1x32x128xf32>
    %19 = vector.shape_cast %18 : vector<1x32x128xf32> to vector<32x128xf32>
    %20 = vector.shape_cast %17 : vector<32x128xf32> to vector<1x32x128xf32>
    tpu.vector_store %arg6[%c0_11, %c0_12, %c0_13], %20 {strides = array<i32>} : memref<1x32x128xf32, #tpu.memory_space<vmem>>, vector<1x32x128xf32>,
    return
  }
  func.func @transform_0(%arg0: i32, %arg1: i32) -> (i32, i32, i32) {
    %c0_i32 = arith.constant 0 : i32
    %c0_i32_0 = arith.constant 0 : i32
    return %arg0, %c0_i32, %arg1 : i32, i32, i32
  }
  func.func @transform_1(%arg0: i32, %arg1: i32) -> (i32, i32) {
    %c0_i32 = arith.constant 0 : i32
    %c0_i32_0 = arith.constant 0 : i32
    %c0_i32_1 = arith.constant 0 : i32
    return %c0_i32, %c0_i32_0 : i32, i32
  }
  func.func @transform_2(%arg0: i32, %arg1: i32) -> (i32, i32) {
    %c0_i32 = arith.constant 0 : i32
    %c0_i32_0 = arith.constant 0 : i32
    %c0_i32_1 = arith.constant 0 : i32
    return %c0_i32, %c0_i32_0 : i32, i32
  }
  func.func @transform_3(%arg0: i32, %arg1: i32) -> (i32, i32) {
    %c0_i32 = arith.constant 0 : i32
    %c0_i32_0 = arith.constant 0 : i32
    %c0_i32_1 = arith.constant 0 : i32
    return %c0_i32, %c0_i32_0 : i32, i32
  }
  func.func @transform_4(%arg0: i32, %arg1: i32) -> (i32, i32, i32) {
    %c0_i32 = arith.constant 0 : i32
    %c0_i32_0 = arith.constant 0 : i32
    return %arg0, %c0_i32, %arg1 : i32, i32, i32
  }
}

</mosaic_0001>

<bundles_post_ra>
// kernel: tpu_custom_call.1
= control target key start
LH: loop header
LB: loop body
LE: loop exit
PB: predicated region body
PF: predicated region fallthrough
CT: control target
= control target key end

     0   :  { %9 = vsyncpa [#allocation3], 0  ;;  %s1053_s0 = inlined_call_operand.vmem [shape: bf16[2,20,128], index: 0, kind: input, shape index: {}]   ;;  %s1054_s1 = inlined_call_operand.vmem [shape: bf16[32,20], index: 1, kind: input, shape index: {}]   ;;  %s1055_s2 = inlined_call_operand.vmem [shape: f32[32,1], index: 2, kind: input, shape index: {}]   ;;  %s1056_s3 = inlined_call_operand.vmem [shape: f32[32,1], index: 3, kind: input, shape index: {}]   ;;  %s1057_s4 = inlined_call_operand.hbm [shape: f32[2,32,128], index: 4, kind: output, shape index: {}]  }
   0x1   :  { %11 = vsyncpa [#allocation3 + $0x1], 0  ;;  %s823_s15 = smov 0   ;;  %s825_s16 = smov 0  }
   0x2   :  { %s827_s17 = smov 0   ;;  %s829_s18 = smov 0  }
   0x3   :  { %s831_s19 = smov 0   ;;  %s833_s20 = smov 0  }
   0x4 LB: > { %s609_s21 = sadd.s32 4294967295, %s793_s20   ;;  %s610_s22 = sadd.s32 4294967294, %s793_s20   ;;  %s793_s20 = sphi %s833_s20, %s17_s20   ;;  %s789_s19 = sphi %s831_s19, %s1064_s19   ;;  %s785_s18 = sphi %s829_s18, %s1063_s18   ;;  %s781_s17 = sphi %s827_s17, %s1062_s17   ;;  %s777_s16 = sphi %s825_s16, %s1061_s16   ;;  %s773_s15 = sphi %s823_s15, %s1060_s15  }
   0x5   : > { %s29_s23 = sadd.s32 1, %s789_s19  ;;  %s129_s24 = sadd.s32 1, %s781_s17 }
   0x6   : > { %p31_p0 = scmp.ge.s32.totalorder %s29_s23, 2  ;;  %p139_p1 = scmp.ne.s32.totalorder %s781_s17, %s777_s16 }
   0x7   : > { %p140_p2 = scmp.eq.s32.totalorder %s609_s21, 1  ;;  %p145_p3 = scmp.ne.s32.totalorder %s777_s16, %s773_s15 }
   0x8   : > { %s1066_s23 = smov (%p31_p0, %s29_s23), 0  ;;  %p146_p5 = scmp.eq.s32.totalorder %s610_s22, 1 }
   0x9   : > { %p863_p4 = por %p140_p2, %p139_p1  ;;  %s124_s26 = ssub.s32 %s789_s19, %s1066_s23 }
   0xa   : > { %p613_p6 = scmp.ge.s32.totalorder %s793_s20, 1  ;;  %p127_p7 = scmp.eq.s32.totalorder %s124_s26, 0 }
   0xb   : > { %p870_p8 = por %p146_p5, %p145_p3  ;;  %p184_p9 = scmp.lt.s32.totalorder %s793_s20, 3 }
   0xc   : > { %s876_s28 = scalar_select %p127_p7, %s781_s17, %s129_s24  }
   0xd   : > { %p185_p10 = pnand %p613_p6, %p184_p9 }
   0xe   : > { %p213_p11 = scmp.lt.s32.totalorder (!%p185_p10), %s785_s18, 1  ;;  %s210_s12 = sand.u32 (!%p185_p10), 1, %s777_s16  }
   0xf   : > { %188 = sbr.rel (%p185_p10) target bundleno = 236 (0xec), region = 36  ;;  %s642_s21 = sshll.u32 (!%p185_p10), %s785_s18, 5 }
  0x10   : > { %s527_s26 = scalar_lea.hbm (!%p185_p10), %s1057_s4, %s642_s21  ;;  %s515_s30 = scalar_lea.sflag (!%p185_p10), [#allocation3], %s210_s12 }
  0x11   : > { %s735_s9 = scalar_lea.hbm (!%p185_p10), %s1057_s4, 64 }
  0x14   : > { %v280_v0 = vld [vmem:[%s1055_s2 + $0x10] sm:$0xff]  ;;  %v278_v1 = vld [vmem:[%s1055_s2] sm:$0xff]  ;;  %v795_v2 = vmov 0   ;;  %s214_s7 = scalar_select %p213_p11, %s785_s18, 1  ;;  %v281_v5 = vld [vmem:[%s1055_s2 + $0x18] sm:$0xff]  ;;  %vm255_vm0 = vcmask 1041408  }
  0x15   : > { %705 = vset.pattern.permute.xlu1 %v795_v2  ;;  %704 = vset.pattern.permute.xlu0 %v795_v2  ;;  %v306_v3 = vld [vmem:[%s1056_s3] sm:$0xff]  ;;  %v279_v6 = vld [vmem:[%s1055_s2 + $0x8] sm:$0xff]  ;;  %v309_v12 = vld [vmem:[%s1056_s3 + $0x18] sm:$0xff]  ;;  %vm248_vm1 = vcmask 162816   ;;  %s530_s18 = sshll.u32 %s527_s26, 4  ;;  %s531_s18 = int_to_ptr.hbm [resolvable:$true] %s530_s18 }
  0x16   : > { %294 = vperm.xlu1 %705, %v280_v0   ;;  %284 = vperm.xlu0 %704, %v278_v1   ;;  %s645_s10 = smul.u32 12, %s214_s7  ;;  %v307_v8 = vld [vmem:[%s1056_s3 + $0x8] sm:$0xff]  ;;  %v308_v13 = vld [vmem:[%s1056_s3 + $0x10] sm:$0xff]  ;;  %v639_v14 = vld [vmem:[%s1054_s1] sm:$0xff]  ;;  %s729_s5 = sshra.s32 %s531_s18, 4  ;;  %s730_s5 = int_to_ptr.hbm [resolvable:$true] %s729_s5 }
  0x17   : > { %706 = vset.pattern.permute.xlu2 %v795_v2  ;;  %v640_v15 = vld [vmem:[%s1054_s1 + $0x8] sm:$0xff]  ;;  %s731_s6 = scalar_lea.hbm %s730_s5, 32  ;;  %p736_p1 = scmp.lt.s32.totalorder %s730_s5, %s1057_s4 }
  0x18   : > { %312 = vperm.xlu2 %706, %v306_v3   ;;  %s220_s13 = scalar_lea.vmem %s1053_s0, %s645_s10  ;;  %p732_p12 = scmp.ne.s32.totalorder %s730_s5, %s731_s6 }
  0x19   : > { %v228_v4 = vld [vmem:[%s220_s13 + $0x8] sm:$0x3]  ;;  %v641_v11 = vld [vmem:[%s220_s13] sm:$0xff]  ;;  %s614_s13 = sshll.u32 %s210_s12, 5  ;;  %p737_p2 = scmp.lt.s32.totalorder %s735_s9, %s731_s6 }
  0x1a   : > { %v244_v7 = vunpack.c.l.b16 %v228_v4  ;;  %s1003_s14 = scalar_lea.vmem [#allocation2], %s614_s13  ;;  %p733_p13 = pnand %p732_p12, %p863_p4 }
  0x1b   : > { %s528_s29 = sshll.u32 %s1003_s14, 4  ;;  %p738_p3 = por %p737_p2, %p736_p1  ;;  %s529_s29 = int_to_ptr.vmem [resolvable:$true] %s528_s29 }
  0x1c   : > { %v246_v9 = vpack.c.b16 %v244_v7, %v244_v7  ;;  %p734_p0 = pneg %p733_p13 }
  0x1e   : > { %299 = vperm.xlu1 %705, %v281_v5   ;;  %289 = vperm.xlu0 %704, %v279_v6   ;;  %v257_v10 = vsel %vm255_vm0, %v246_v9, 0  ;;  %p739_p5 = pnand %p738_p3, %p734_p0 }
  0x1f   : > { %265 = vmatpush.bf16.msra.mxu0 %v257_v10  ;;  %643 = vmatpush.bf16.msra.mxu1 %v257_v10 }
  0x20   : > { %317 = vperm.xlu2 %706, %v307_v8  }
  0x23   : > { %266 = vmatpush.bf16.msra.mxu0 %v641_v11  ;;  %644 = vmatpush.bf16.msra.mxu1 %v641_v11 }
  0x26   : > { %327 = vperm.xlu1 %705, %v309_v12   ;;  %322 = vperm.xlu0 %704, %v308_v13  }
  0x27   : > { %628 = vmatmul.msk.bf16.vlgmr.msra.gmra.mxu0 %vm248_vm1, %v639_v14  ;;  %629 = vmatmul.msk.bf16.vlgmr.msra.gmra.mxu1 %vm248_vm1, %v640_v15 }
  0x72   : > { %v313_v19 = vpop.permute.xlu2 %312 }
  0x7a   : > { %v318_v38 = vpop.permute.xlu2 %317 }
  0x88   : > { %v285_v16 = vpop.permute.xlu0 %284  ;;  %v295_v17 = vpop.permute.xlu1 %294 }
  0x90   : > { %v290_v18 = vpop.permute.xlu0 %289  ;;  %v300_v22 = vpop.permute.xlu1 %299 }
  0x98   : > { %v323_v25 = vpop.permute.xlu0 %322  ;;  %v328_v39 = vpop.permute.xlu1 %327 }
  0xa4   : > { %v268_v20 = vpop.f32.mrf.mxu0  ;;  %v273_v21 = vpop.f32.mrf.mxu1 }
  0xa5   : > { %v302_v23 = vmul.f32 %v285_v16, %v268_v20  ;;  %v304_v24 = vmul.f32 %v295_v17, %v273_v21 }
  0xa7   : > { %v913_v26 = vadd.f32 %v313_v19, %v302_v23  ;;  %v915_v27 = vadd.f32 %v323_v25, %v304_v24 }
  0xa9   : > { %v918_v28 = vmul.f32 0.70710677, %v913_v26  ;;  %v921_v29 = vmul.f32 0.70710677, %v915_v27 }
  0xab   : > { %v342_v30 = vmul.f32 %v918_v28, %v918_v28  ;;  %v422_v31 = vmul.f32 %v921_v29, %v921_v29 }
  0xac   : > { %v270_v32 = vpop.f32.mrf.mxu0  ;;  %v275_v33 = vpop.f32.mrf.mxu1 }
  0xad   : > { %v927_v34 = vmin.f32 %v342_v30, 16.0  ;;  %v929_v35 = vmin.f32 %v422_v31, 16.0  ;;  %v303_v36 = vmul.f32 %v290_v18, %v270_v32  ;;  %v305_v37 = vmul.f32 %v300_v22, %v275_v33 }
  0xaf   : > { %v344_v40 = vmul.f32 2.1237322e-06, %v927_v34  ;;  %v355_v41 = vmul.f32 3.8918573e-05, %v927_v34  ;;  %v424_v42 = vmul.f32 2.1237322e-06, %v929_v35  ;;  %v934_v43 = vadd.f32 %v318_v38, %v303_v36 }
  0xb0   : > { %v435_v44 = vmul.f32 3.8918573e-05, %v929_v35  ;;  %v937_v45 = vadd.f32 %v328_v39, %v305_v37 }
  0xb1   : > { %v345_v46 = vadd.f32 0.00028619796, %v344_v40  ;;  %v356_v47 = vadd.f32 0.001143296, %v355_v41  ;;  %v425_v48 = vadd.f32 0.00028619796, %v424_v42 }
  0xb2   : > { %v436_v49 = vadd.f32 0.001143296, %v435_v44  ;;  %v940_v50 = vmul.f32 0.70710677, %v934_v43  ;;  %v946_v54 = vmul.f32 0.70710677, %v937_v45 }
  0xb3   : > { %v346_v51 = vmul.f32 %v345_v46, %v927_v34  ;;  %v357_v52 = vmul.f32 %v356_v47, %v927_v34  ;;  %v426_v53 = vmul.f32 %v425_v48, %v929_v35 }
  0xb4   : > { %v437_v55 = vmul.f32 %v436_v49, %v929_v35  ;;  %v382_v56 = vmul.f32 %v940_v50, %v940_v50  ;;  %v462_v60 = vmul.f32 %v946_v54, %v946_v54 }
  0xb5   : > { %v347_v57 = vadd.f32 0.0036580483, %v346_v51  ;;  %v358_v58 = vadd.f32 0.014752088, %v357_v52  ;;  %v427_v59 = vadd.f32 0.0036580483, %v426_v53 }
  0xb6   : > { %v438_v61 = vadd.f32 0.014752088, %v437_v55  ;;  %v953_v62 = vmin.f32 %v382_v56, 16.0  ;;  %v958_v2 = vmin.f32 %v462_v60, 16.0 }
  0xb7   : > { %v348_v63 = vmul.f32 %v347_v57, %v927_v34  ;;  %v359_v0 = vmul.f32 %v358_v58, %v927_v34  ;;  %v428_v1 = vmul.f32 %v427_v59, %v929_v35 }
  0xb8   : > { %v439_v3 = vmul.f32 %v438_v61, %v929_v35  ;;  %v384_v4 = vmul.f32 2.1237322e-06, %v953_v62  ;;  %v395_v5 = vmul.f32 3.8918573e-05, %v953_v62  ;;  %v464_v14 = vmul.f32 2.1237322e-06, %v958_v2 }
  0xb9   : > { %v349_v6 = vadd.f32 0.05243302, %v348_v63  ;;  %v360_v7 = vadd.f32 0.112945676, %v359_v0  ;;  %v429_v13 = vadd.f32 0.05243302, %v428_v1 }
  0xba   : > { %v440_v8 = vadd.f32 0.112945676, %v439_v3  ;;  %v385_v9 = vadd.f32 0.00028619796, %v384_v4  ;;  %v396_v10 = vadd.f32 0.001143296, %v395_v5 }
  0xbb   : > { %v350_v11 = vmul.f32 %v349_v6, %v927_v34  ;;  %v361_v12 = vmul.f32 %v360_v7, %v927_v34  ;;  %v475_v18 = vmul.f32 3.8918573e-05, %v958_v2  ;;  %v430_v24 = vmul.f32 %v429_v13, %v929_v35 }
  0xbc   : > { %v441_v15 = vmul.f32 %v440_v8, %v929_v35  ;;  %v386_v16 = vmul.f32 %v385_v9, %v953_v62  ;;  %v397_v17 = vmul.f32 %v396_v10, %v953_v62  ;;  %v465_v32 = vadd.f32 0.00028619796, %v464_v14 }
  0xbd   : > { %v362_v19 = vadd.f32 0.4994258, %v361_v12  ;;  %v351_v22 = vadd.f32 0.18741608, %v350_v11  ;;  %v476_v33 = vadd.f32 0.001143296, %v475_v18 }
  0xbe   : > { %v442_v20 = vadd.f32 0.4994258, %v441_v15  ;;  %v398_v21 = vadd.f32 0.014752088, %v397_v17  ;;  %v387_v25 = vadd.f32 0.0036580483, %v386_v16  ;;  %v466_v44 = vmul.f32 %v465_v32, %v958_v2 }
  0xbf   : > { %v363_v23 = vmul.f32 %v362_v19, %v927_v34  ;;  %v477_v39 = vmul.f32 %v476_v33, %v958_v2  ;;  %v352_v40 = vmul.f32 %v351_v22, %v927_v34  ;;  %v431_v41 = vadd.f32 0.18741608, %v430_v24 }
  0xc0   : > { %v443_v30 = vmul.f32 %v442_v20, %v929_v35  ;;  %v399_v31 = vmul.f32 %v398_v21, %v953_v62  ;;  %v388_v42 = vmul.f32 %v387_v25, %v953_v62  ;;  %v467_v53 = vadd.f32 0.0036580483, %v466_v44 }
  0xc1   : > { %v364_v36 = vadd.f32 1.0, %v363_v23  ;;  %v478_v47 = vadd.f32 0.014752088, %v477_v39  ;;  %v353_v48 = vadd.f32 1.1283791, %v352_v40  ;;  %v432_v49 = vmul.f32 %v431_v41, %v929_v35 }
  0xc2   : > { %v444_v37 = vadd.f32 1.0, %v443_v30  ;;  %v400_v38 = vadd.f32 0.112945676, %v399_v31  ;;  %v389_v51 = vadd.f32 0.05243302, %v388_v42  ;;  %v468_v35 = vmul.f32 %v467_v53, %v958_v2 }
  0xc3   : > { %707 = vrcp.f32 %v364_v36  ;;  %v479_v55 = vmul.f32 %v478_v47, %v958_v2  ;;  %v354_v59 = vmul.f32 %v353_v48, %v918_v28  ;;  %v433_v60 = vadd.f32 1.1283791, %v432_v49 }
  0xc4   : > { %709 = vrcp.f32 %v444_v37  ;;  %v401_v46 = vmul.f32 %v400_v38, %v953_v62  ;;  %v390_v1 = vmul.f32 %v389_v51, %v953_v62  ;;  %v374_v4 = vand.u32 2147483647, %v364_v36 }
  0xc5   : > { %v480_v63 = vadd.f32 0.112945676, %v479_v55  ;;  %v376_v5 = vand.u32 2147483648, %v364_v36  ;;  %v456_v9 = vand.u32 2147483648, %v444_v37  ;;  %v454_v10 = vand.u32 2147483647, %v444_v37 }
  0xc6   : > { %v402_v52 = vadd.f32 0.4994258, %v401_v46  ;;  %vm370_vm4 = vweird.f32 %v364_v36  ;;  %v391_v13 = vadd.f32 0.18741608, %v390_v1  ;;  %v469_v14 = vadd.f32 0.05243302, %v468_v35 }
  0xc7   : > { %v481_v7 = vmul.f32 %v480_v63, %v958_v2  ;;  %v377_v15 = vor.u32 1.1754944e-38, %v376_v5  ;;  %vm450_vm6 = vweird.f32 %v444_v37  ;;  %vm375_vm7 = vcmp.eq.f32.partialorder %v374_v4, 8.507059e+37 }
  0xc8   : > { %v403_v58 = vmul.f32 %v402_v52, %v953_v62  ;;  %v434_v19 = vmul.f32 %v433_v60, %v921_v29  ;;  %v457_v20 = vor.u32 1.1754944e-38, %v456_v9  ;;  %vm455_vm9 = vcmp.eq.f32.partialorder %v454_v10, 8.507059e+37 }
  0xc9   : > { %v708_v56 = vpop.eup %707  ;;  %v482_v11 = vadd.f32 0.4994258, %v481_v7  ;;  %v392_v31 = vmul.f32 %v391_v13, %v953_v62  ;;  %v470_v32 = vmul.f32 %v469_v14, %v958_v2  ;;  %v336_v38 = vmul.f32 0.5, %v915_v27 }
  0xca   : > { %v710_v34 = vpop.eup %709  ;;  %v366_v57 = vmul.f32 %v708_v56, %v364_v36  ;;  %v984_v3 = vadd.f32 1.0, %v403_v58  ;;  %vm371_vm2 = vweird.f32 %v708_v56  ;;  %v337_v9 = vmul.f32 0.5, %v937_v45 }
  0xcb   : > { %v446_v61 = vmul.f32 %v710_v34, %v444_v37  ;;  %vm451_vm3 = vweird.f32 %v710_v34  ;;  %vm372_vm5 = vmor %vm370_vm4, %vm371_vm2  ;;  %v483_v17 = vmul.f32 %v482_v11, %v958_v2  ;;  %v334_v37 = vmul.f32 0.5, %v913_v26 }
  0xcc   : > { %v367_v0 = vsub.f32 1.0, %v366_v57  ;;  %711 = vrcp.f32 %v984_v3  ;;  %vm452_vm8 = vmor %vm450_vm6, %vm451_vm3  ;;  %v393_v42 = vadd.f32 1.1283791, %v392_v31  ;;  %v416_v44 = vand.u32 2147483648, %v984_v3 }
  0xcd   : > { %v447_v6 = vsub.f32 1.0, %v446_v61  ;;  %v484_v23 = vadd.f32 1.0, %v483_v17  ;;  %v471_v62 = vadd.f32 0.18741608, %v470_v32  ;;  %v414_v48 = vand.u32 2147483647, %v984_v3 }
  0xce   : > { %v368_v8 = vmul.f32 %v708_v56, %v367_v0  ;;  %vm410_vm11 = vweird.f32 %v984_v3  ;;  %v417_v27 = vor.u32 1.1754944e-38, %v416_v44  ;;  %v394_v55 = vmul.f32 %v393_v42, %v940_v50 }
  0xcf   : > { %v448_v28 = vmul.f32 %v710_v34, %v447_v6  ;;  %713 = vrcp.f32 %v484_v23  ;;  %v472_v53 = vmul.f32 %v471_v62, %v958_v2  ;;  %vm415_vm13 = vcmp.eq.f32.partialorder %v414_v48, 8.507059e+37 }
  0xd0   : > { %v369_v12 = vadd.f32 %v708_v56, %v368_v8  ;;  %v496_v61 = vand.u32 2147483648, %v484_v23  ;;  %v494_v1 = vand.u32 2147483647, %v484_v23  ;;  %vm490_vm15 = vweird.f32 %v484_v23 }
  0xd1   : > { %v449_v16 = vadd.f32 %v710_v34, %v448_v28  ;;  %v473_v60 = vadd.f32 1.1283791, %v472_v53 }
  0xd2   : > { %v373_v18 = vsel %vm372_vm5, %v708_v56, %v369_v12  ;;  %v712_v24 = vpop.eup %711  ;;  %v497_v50 = vor.u32 1.1754944e-38, %v496_v61  ;;  %vm495_vm1 = vcmp.eq.f32.partialorder %v494_v1, 8.507059e+37 }
  0xd3   : > { %v378_v21 = vsel %vm375_vm7, %v377_v15, %v373_v18  ;;  %v453_v22 = vsel %vm452_vm8, %v710_v34, %v449_v16  ;;  %v406_v36 = vmul.f32 %v712_v24, %v984_v3  ;;  %vm411_vm10 = vweird.f32 %v712_v24 }
  0xd4   : > { %v379_v25 = vmul.f32 %v378_v21, %v354_v59  ;;  %v458_v30 = vsel %vm455_vm9, %v457_v20, %v453_v22  ;;  %vm412_vm12 = vmor %vm410_vm11, %vm411_vm10  ;;  %v335_v3 = vmul.f32 0.5, %v934_v43  ;;  %v474_v5 = vmul.f32 %v473_v60, %v946_v54 }
  0xd5   : > { %v459_v33 = vmul.f32 %v458_v30, %v434_v19  ;;  %v407_v40 = vsub.f32 1.0, %v406_v36  ;;  %v714_v26 = vpop.eup %713 }
  0xd6   : > { %v630_v29 = vclamps-f32 %v379_v25, 1.0  ;;  %v486_v34 = vmul.f32 %v714_v26, %v484_v23  ;;  %vm491_vm14 = vweird.f32 %v714_v26 }
  0xd7   : > { %v632_v39 = vclamps-f32 %v459_v33, 1.0  ;;  %v408_v47 = vmul.f32 %v712_v24, %v407_v40  ;;  %vm492_vm0 = vmor %vm490_vm15, %vm491_vm14 }
  0xd8   : > { %v502_v41 = vadd.f32 1.0, %v630_v29  ;;  %v487_v59 = vsub.f32 1.0, %v486_v34 }
  0xd9   : > { %v504_v46 = vadd.f32 1.0, %v632_v39  ;;  %v409_v52 = vadd.f32 %v712_v24, %v408_v47 }
  0xda   : > { %v506_v49 = vmul.f32 %v502_v41, %v334_v37  ;;  %v488_v0 = vmul.f32 %v714_v26, %v487_v59 }
  0xdb   : > { %v508_v51 = vmul.f32 %v504_v46, %v336_v38  ;;  %v413_v56 = vsel %vm412_vm12, %v712_v24, %v409_v52 }
  0xdc   : > { %510 = vst [vmem:[%s1003_s14] sm:$0xff] %v506_v49  ;;  %v418_v57 = vsel %vm415_vm13, %v417_v27, %v413_v56  ;;  %v489_v35 = vadd.f32 %v714_v26, %v488_v0 }
  0xdd   : > { %512 = vst [vmem:[%s1003_s14 + $0x10] sm:$0xff] %v508_v51  ;;  %v419_v58 = vmul.f32 %v418_v57, %v394_v55 }
  0xde   : > { %v493_v6 = vsel %vm492_vm0, %v714_v26, %v489_v35 }
  0xdf   : > { %v631_v63 = vclamps-f32 %v419_v58, 1.0  ;;  %v498_v7 = vsel %vm495_vm1, %v497_v50, %v493_v6 }
  0xe0   : > { %v499_v43 = vmul.f32 %v498_v7, %v474_v5 }
  0xe1   : > { %v503_v2 = vadd.f32 1.0, %v631_v63 }
  0xe2   : > { %v633_v8 = vclamps-f32 %v499_v43, 1.0 }
  0xe3   : > { %v507_v4 = vmul.f32 %v503_v2, %v335_v3 }
  0xe4   : > { %v505_v28 = vadd.f32 1.0, %v633_v8 }
  0xe5   : > { %511 = vst [vmem:[%s1003_s14 + $0x8] sm:$0xff] %v507_v4 }
  0xe6   : > { %v509_v54 = vmul.f32 %v505_v28, %v337_v9 }
  0xe8   : > { %513 = vst [vmem:[%s1003_s14 + $0x18] sm:$0xff] %v509_v54 }
  0xe9   : > { %742 = shalt.err (!%p739_p5)
}
  0xea   : > { %s796_s12 = smov 128   ;;  %s797_s13 = smov 8  }
  0xeb   : > { %646 = dma.vmem_to_hbm [thread:$0]  (%p863_p4), %s529_s29, 512, %s531_s18, %s515_s30, %s796_s12, %s796_s12, %s797_s13  }
  0xec PF: > { %p652_p6 = scmp.ge.s32.totalorder %s793_s20, 2  ;;  %s545_s14 = sand.u32 1, %s773_s15  }
  0xed   : > { %s546_s21 = scalar_lea.sflag [#allocation3], %s545_s14 }
  0xee   : > { %p649_p7 = pnand %p652_p6, %p870_p8 }
  0xf0   : > { %p650_p9 = pneg %p649_p7 }
  0xf2   : > { %768 = dma.done.wait (%p650_p9), %s546_s21, 512  }
  0xf3   : > { %770 = vsyncadd (%p650_p9), %s546_s21, 4294966784  ;;  %s17_s20 = sadd.s32 1, %s793_s20   ;;  %s1060_s15 = smov %s777_s16 }
  0xf4   : > { %p14_p10 = scmp.ge.s32.totalorder %s17_s20, 4   ;;  %s1061_s16 = smov %s781_s17 }
  0xf5   : > { %s1062_s17 = smov %s876_s28  ;;  %s1063_s18 = smov %s789_s19 }
  0xf6   : > { %s1064_s19 = smov %s1066_s23  ;;  %16 = sbr.rel (!%p14_p10) target bundleno = 4 (0x4), region = 71 }
  0xfb   :  { %552 = vsyncpa [#allocation3], 1 }
  0xfc   :  { %554 = vsyncpa [#allocation3 + $0x1], 1 }

</bundles_post_ra>
